<compile_context>
chip_gen: v6e
topology: v6e:2x2x1
jax: 0.10.0
libtpu: 0.0.40
codegen_flags: <defaults>
</compile_context>

<pallas_src>
import functools

import jax
import jax.numpy as jnp
from jax import lax
from jax.experimental import pallas as pl
from jax.experimental.pallas import tpu as pltpu


def _conv_relu_kernel(x_ref, w_ref, b_ref, o_ref, xp_ref, *,
                      H, W, KH, KW, pad, padf):
    # x_ref:  (1, Cin, H*W)               flat NCHW input slab (lane dim = H*W)
    # w_ref:  (KH*KW, Cout, Cin)          per-tap weight slabs
    # b_ref:  (Cout, 1)                   bias
    # o_ref:  (1, Cout, H*W)              flat NCHW output (lane-dense stores)
    # xp_ref: (Cin, padf + H*W + padf)    zero-halo flat scratch (padf lane-aligned)
    Cin = x_ref.shape[1]
    Cout = w_ref.shape[1]
    HW = H * W

    # Zero ONLY the halo columns (interior is fully overwritten on the next line).
    # Done every grid step so a megacore-split grid never sees stale halo data.
    xp_ref[:, :padf] = jnp.zeros((Cin, padf), xp_ref.dtype)
    xp_ref[:, padf + HW:] = jnp.zeros((Cin, padf), xp_ref.dtype)
    xp_ref[:, padf:padf + HW] = x_ref[0]            # lane-aligned interior store

    # Hoisted kw edge masks: column index of each flat output position, and one
    # validity mask per nonzero dw, computed once and reused across all kh.
    col = lax.broadcasted_iota(jnp.int32, (1, HW), 1) % W
    masks = {}
    for dw in range(-pad, pad + 1):
        if dw != 0:
            masks[dw] = (col + dw >= 0) & (col + dw < W)

    # f32 accumulator in vregs, bias folded in at init.
    acc = jnp.broadcast_to(b_ref[...].astype(jnp.float32), (Cout, HW))

    # 9 tap matmuls accumulated directly — no materialized im2col patch.
    for kh in range(KH):
        dh = kh - pad
        for kw in range(KW):
            dw = kw - pad
            off = dh * W + dw
            tap = xp_ref[:, padf + off:padf + off + HW]      # (Cin, HW)
            if dw != 0:
                tap = jnp.where(masks[dw], tap, 0.0)
            t = kh * KW + kw
            acc = acc + jnp.dot(w_ref[t], tap,
                                preferred_element_type=jnp.float32)

    acc = jnp.maximum(acc, 0.0)          # ReLU (f32 epilogue)
    o_ref[0] = acc.astype(o_ref.dtype)   # lane-dense (Cout, HW) store


def conv2d_relu(x_nchw, w_oihw, bias, padding=1):
    """Conv2d(stride=1, 'same' padding) + bias + ReLU via a Pallas TPU kernel."""
    N, Cin, H, W = x_nchw.shape
    Cout, Cin_w, KH, KW = w_oihw.shape
    assert Cin == Cin_w
    assert KH == KW and KH == 2 * padding + 1, "kernel assumes 'same' conv (k=2p+1)"
    HW = H * W

    # Free metadata reshapes (no transpose of the activation tensor).
    x_flat = x_nchw.reshape(N, Cin, HW)
    # (Cout, Cin, KH, KW) -> (KH*KW, Cout, Cin): per-tap weight slabs (tiny one-off
    # reorder of the weights only).
    w_taps = jnp.transpose(w_oihw, (2, 3, 0, 1)).reshape(KH * KW, Cout, Cin)
    b2d = bias.reshape(Cout, 1)

    # Halo size for the flat padded scratch, rounded up to a lane multiple so the
    # interior store stays lane-aligned; taps read at (padf + off).
    padf = pl.cdiv(padding * W + padding, 128) * 128
    # VMEM reads have no runtime bounds check — keep this explicit guard.
    assert padf >= padding * W + padding

    kernel = functools.partial(_conv_relu_kernel, H=H, W=W, KH=KH, KW=KW,
                               pad=padding, padf=padf)

    # Scoped-VMEM budget: halo slab + double-buffered I/O blocks + weights/bias,
    # with 2x headroom, clamped to a sane range.
    dtype_bytes = jnp.dtype(x_nchw.dtype).itemsize
    slab_bytes = Cin * (padf + HW + padf) * dtype_bytes
    io_bytes = 2 * 2 * (Cin + Cout) * HW * dtype_bytes       # double-buffered in/out
    w_bytes = 2 * (KH * KW * Cout * Cin + Cout) * dtype_bytes
    vmem_limit = int(min(128 * 1024 * 1024,
                         max(32 * 1024 * 1024,
                             2 * (slab_bytes + io_bytes + w_bytes))))

    out_flat = pl.pallas_call(
        kernel,
        out_shape=jax.ShapeDtypeStruct((N, Cout, HW), x_nchw.dtype),
        grid_spec=pltpu.PrefetchScalarGridSpec(
            num_scalar_prefetch=0,
            grid=(N,),  # one grid step per batch element
            in_specs=[
                pl.BlockSpec((1, Cin, HW), lambda n: (n, 0, 0)),
                pl.BlockSpec((KH * KW, Cout, Cin), lambda n: (0, 0, 0)),
                pl.BlockSpec((Cout, 1), lambda n: (0, 0)),
            ],
            out_specs=pl.BlockSpec((1, Cout, HW), lambda n: (n, 0, 0)),
            scratch_shapes=[
                pltpu.VMEM((Cin, padf + HW + padf), x_nchw.dtype),
            ],
        ),
        compiler_params=pltpu.CompilerParams(
            dimension_semantics=("parallel",),
            vmem_limit_bytes=vmem_limit,
        ),
    )(x_flat, w_taps, b2d)

    # Free reshape back to PyTorch NCHW.
    return out_flat.reshape(N, Cout, H, W)


if __name__ == "__main__":
    # Small, deterministic synthetic setup consistent with the module (bn=False).
    N, Cin, Cout, H, W = 2, 4, 8, 16, 16
    KH = KW = 3
    pad = 1

    key = jax.random.PRNGKey(0)
    kx, kw, kb = jax.random.split(key, 3)
    x = jax.random.normal(kx, (N, Cin, H, W), dtype=jnp.float32)
    bound = 1.0 / (Cin * KH * KW) ** 0.5
    w = jax.random.uniform(kw, (Cout, Cin, KH, KW), jnp.float32, -bound, bound)
    b = jax.random.uniform(kb, (Cout,), jnp.float32, -bound, bound)

    out = conv2d_relu(x, w, b, padding=pad)
    out = jax.block_until_ready(out)

    # Cross-check against XLA's conv to validate semantics.
    ref = jax.lax.conv_general_dilated(
        x, w, window_strides=(1, 1), padding=((pad, pad), (pad, pad)),
        dimension_numbers=("NCHW", "OIHW", "NCHW"),
    ) + b[None, :, None, None]
    ref = jnp.maximum(ref, 0.0)
    assert out.shape == (N, Cout, H, W)
    assert jnp.allclose(out, ref, atol=1e-4, rtol=1e-4)

    print("KERNEL_OK")
</pallas_src>

<mosaic_0001>
module attributes {stable_mosaic.version = 11 : i64} {
  func.func @_conv_relu_kernel(%arg0: i32, %arg1: memref<1x4x256xf32, #tpu.memory_space<vmem>>, %arg2: memref<9x8x4xf32, #tpu.memory_space<vmem>>, %arg3: memref<8x1xf32, #tpu.memory_space<vmem>>, %arg4: memref<1x8x256xf32, #tpu.memory_space<vmem>>, %arg5: memref<4x512xf32, #tpu.memory_space<vmem>>) attributes {dimension_semantics = [#tpu.dimension_semantics<parallel>], iteration_bounds = array<i64: 2>, scalar_prefetch = 0 : i64, scratch_operands = 1 : i64, tpu.core_type = #tpu.core_type<tc>, window_params = [{transform_indices = @transform_0, window_bounds = array<i64: 1, 4, 256>}, {pipeline_mode = #tpu.pipeline_mode<synchronous>, transform_indices = @transform_1, window_bounds = array<i64: 9, 8, 4>}, {pipeline_mode = #tpu.pipeline_mode<synchronous>, transform_indices = @transform_2, window_bounds = array<i64: 8, 1>}, {transform_indices = @transform_3, window_bounds = array<i64: 1, 8, 256>}]} {
    %cst = arith.constant 0.000000e+00 : f32
    %0 = vector.broadcast %cst : f32 to vector<4x128xf32>
    %c0 = arith.constant 0 : index
    %c0_0 = arith.constant 0 : index
    %1 = vector.load %arg5[%c0, %c0_0] : memref<4x512xf32, #tpu.memory_space<vmem>>, vector<4x128xf32>
    tpu.vector_store %arg5[%c0, %c0_0], %0 {strides = array<i32>} : memref<4x512xf32, #tpu.memory_space<vmem>>, vector<4x128xf32>,
    %cst_1 = arith.constant 0.000000e+00 : f32
    %2 = vector.broadcast %cst_1 : f32 to vector<4x128xf32>
    %c0_2 = arith.constant 0 : index
    %c384 = arith.constant 384 : index
    %3 = vector.load %arg5[%c0_2, %c384] : memref<4x512xf32, #tpu.memory_space<vmem>>, vector<4x128xf32>
    tpu.vector_store %arg5[%c0_2, %c384], %2 {strides = array<i32>} : memref<4x512xf32, #tpu.memory_space<vmem>>, vector<4x128xf32>,
    %c0_3 = arith.constant 0 : index
    %c0_4 = arith.constant 0 : index
    %c0_5 = arith.constant 0 : index
    %4 = vector.load %arg1[%c0_3, %c0_4, %c0_5] : memref<1x4x256xf32, #tpu.memory_space<vmem>>, vector<1x4x256xf32>
    %5 = vector.shape_cast %4 : vector<1x4x256xf32> to vector<4x256xf32>
    %c0_6 = arith.constant 0 : index
    %c128 = arith.constant 128 : index
    %6 = vector.load %arg5[%c0_6, %c128] : memref<4x512xf32, #tpu.memory_space<vmem>>, vector<4x256xf32>
    tpu.vector_store %arg5[%c0_6, %c128], %5 {strides = array<i32>} : memref<4x512xf32, #tpu.memory_space<vmem>>, vector<4x256xf32>,
    %7 = tpu.iota {dimensions = array<i32: 1>} : vector<1x256xi32>
    %c16_i32 = arith.constant 16 : i32
    %c0_i32 = arith.constant 0 : i32
    %8 = arith.cmpi eq, %c16_i32, %c0_i32 : i32
    %c1_i32 = arith.constant 1 : i32
    %9 = arith.select %8, %c1_i32, %c16_i32 : i32
    %10 = vector.broadcast %9 : i32 to vector<1x256xi32>
    %11 = arith.remsi %7, %10 : vector<1x256xi32>
    %c0_i32_7 = arith.constant 0 : i32
    %12 = vector.broadcast %c0_i32_7 : i32 to vector<1x256xi32>
    %13 = arith.cmpi ne, %11, %12 : vector<1x256xi32>
    %c0_i32_8 = arith.constant 0 : i32
    %14 = vector.broadcast %c0_i32_8 : i32 to vector<1x256xi32>
    %15 = arith.cmpi slt, %11, %14 : vector<1x256xi32>
    %c0_i32_9 = arith.constant 0 : i32
    %16 = arith.cmpi slt, %9, %c0_i32_9 : i32
    %17 = vector.broadcast %16 : i1 to vector<1x256xi1>
    %18 = vector.broadcast %17 : vector<1x256xi1> to vector<1x256xi1>
    %19 = arith.xori %15, %18 : vector<1x256xi1>
    %20 = arith.andi %19, %13 : vector<1x256xi1>
    %21 = vector.broadcast %9 : i32 to vector<1x256xi32>
    %22 = arith.addi %11, %21 : vector<1x256xi32>
    %23 = arith.select %20, %22, %11 : vector<1x256xi1>, vector<1x256xi32>
    %c-1_i32 = arith.constant -1 : i32
    %24 = vector.broadcast %c-1_i32 : i32 to vector<1x256xi32>
    %25 = arith.addi %23, %24 : vector<1x256xi32>
    %c0_i32_10 = arith.constant 0 : i32
    %26 = vector.broadcast %c0_i32_10 : i32 to vector<1x256xi32>
    %27 = arith.cmpi sge, %25, %26 : vector<1x256xi32>
    %c-1_i32_11 = arith.constant -1 : i32
    %28 = vector.broadcast %c-1_i32_11 : i32 to vector<1x256xi32>
    %29 = arith.addi %23, %28 : vector<1x256xi32>
    %c16_i32_12 = arith.constant 16 : i32
    %30 = vector.broadcast %c16_i32_12 : i32 to vector<1x256xi32>
    %31 = arith.cmpi slt, %29, %30 : vector<1x256xi32>
    %32 = arith.andi %27, %31 : vector<1x256xi1>
    %c1_i32_13 = arith.constant 1 : i32
    %33 = vector.broadcast %c1_i32_13 : i32 to vector<1x256xi32>
    %34 = arith.addi %23, %33 : vector<1x256xi32>
    %c0_i32_14 = arith.constant 0 : i32
    %35 = vector.broadcast %c0_i32_14 : i32 to vector<1x256xi32>
    %36 = arith.cmpi sge, %34, %35 : vector<1x256xi32>
    %c1_i32_15 = arith.constant 1 : i32
    %37 = vector.broadcast %c1_i32_15 : i32 to vector<1x256xi32>
    %38 = arith.addi %23, %37 : vector<1x256xi32>
    %c16_i32_16 = arith.constant 16 : i32
    %39 = vector.broadcast %c16_i32_16 : i32 to vector<1x256xi32>
    %40 = arith.cmpi slt, %38, %39 : vector<1x256xi32>
    %41 = arith.andi %36, %40 : vector<1x256xi1>
    %c0_17 = arith.constant 0 : index
    %c0_18 = arith.constant 0 : index
    %42 = vector.load %arg3[%c0_17, %c0_18] : memref<8x1xf32, #tpu.memory_space<vmem>>, vector<8x1xf32>
    %43 = vector.shape_cast %42 : vector<8x1xf32> to vector<8x1xf32>
    %44 = vector.broadcast %43 : vector<8x1xf32> to vector<8x256xf32>
    %c0_19 = arith.constant 0 : index
    %c111 = arith.constant 111 : index
    %45 = vector.load %arg5[%c0_19, %c111] : memref<4x512xf32, #tpu.memory_space<vmem>>, vector<4x256xf32>
    %cst_20 = arith.constant 0.000000e+00 : f32
    %46 = vector.shape_cast %32 : vector<1x256xi1> to vector<1x256xi1>
    %47 = vector.broadcast %46 : vector<1x256xi1> to vector<4x256xi1>
    %48 = vector.broadcast %cst_20 : f32 to vector<4x256xf32>
    %49 = arith.select %47, %45, %48 : vector<4x256xi1>, vector<4x256xf32>
    %c0_21 = arith.constant 0 : index
    %c0_22 = arith.constant 0 : index
    %c0_23 = arith.constant 0 : index
    %50 = vector.load %arg2[%c0_21, %c0_22, %c0_23] : memref<9x8x4xf32, #tpu.memory_space<vmem>>, vector<1x8x4xf32>
    %51 = vector.shape_cast %50 : vector<1x8x4xf32> to vector<8x4xf32>
    %cst_24 = arith.constant dense<0.000000e+00> : vector<8x256xf32>
    %52 = tpu.matmul %51, %49, %cst_24 {dimension_numbers = #tpu.dot_dimension_numbers<[1], [0], [0], [1], [0, 0, 1, 1], [], []>} : vector<8x4xf32>, vector<4x256xf32>, vector<8x256xf32> -> vector<8x256xf32>
    %53 = arith.addf %44, %52 : vector<8x256xf32>
    %c0_25 = arith.constant 0 : index
    %c112 = arith.constant 112 : index
    %54 = vector.load %arg5[%c0_25, %c112] : memref<4x512xf32, #tpu.memory_space<vmem>>, vector<4x256xf32>
    %c1 = arith.constant 1 : index
    %c0_26 = arith.constant 0 : index
    %c0_27 = arith.constant 0 : index
    %55 = vector.load %arg2[%c1, %c0_26, %c0_27] : memref<9x8x4xf32, #tpu.memory_space<vmem>>, vector<1x8x4xf32>
    %56 = vector.shape_cast %55 : vector<1x8x4xf32> to vector<8x4xf32>
    %cst_28 = arith.constant dense<0.000000e+00> : vector<8x256xf32>
    %57 = tpu.matmul %56, %54, %cst_28 {dimension_numbers = #tpu.dot_dimension_numbers<[1], [0], [0], [1], [0, 0, 1, 1], [], []>} : vector<8x4xf32>, vector<4x256xf32>, vector<8x256xf32> -> vector<8x256xf32>
    %58 = arith.addf %53, %57 : vector<8x256xf32>
    %c0_29 = arith.constant 0 : index
    %c113 = arith.constant 113 : index
    %59 = vector.load %arg5[%c0_29, %c113] : memref<4x512xf32, #tpu.memory_space<vmem>>, vector<4x256xf32>
    %cst_30 = arith.constant 0.000000e+00 : f32
    %60 = vector.shape_cast %41 : vector<1x256xi1> to vector<1x256xi1>
    %61 = vector.broadcast %60 : vector<1x256xi1> to vector<4x256xi1>
    %62 = vector.broadcast %cst_30 : f32 to vector<4x256xf32>
    %63 = arith.select %61, %59, %62 : vector<4x256xi1>, vector<4x256xf32>
    %c2 = arith.constant 2 : index
    %c0_31 = arith.constant 0 : index
    %c0_32 = arith.constant 0 : index
    %64 = vector.load %arg2[%c2, %c0_31, %c0_32] : memref<9x8x4xf32, #tpu.memory_space<vmem>>, vector<1x8x4xf32>
    %65 = vector.shape_cast %64 : vector<1x8x4xf32> to vector<8x4xf32>
    %cst_33 = arith.constant dense<0.000000e+00> : vector<8x256xf32>
    %66 = tpu.matmul %65, %63, %cst_33 {dimension_numbers = #tpu.dot_dimension_numbers<[1], [0], [0], [1], [0, 0, 1, 1], [], []>} : vector<8x4xf32>, vector<4x256xf32>, vector<8x256xf32> -> vector<8x256xf32>
    %67 = arith.addf %58, %66 : vector<8x256xf32>
    %c0_34 = arith.constant 0 : index
    %c127 = arith.constant 127 : index
    %68 = vector.load %arg5[%c0_34, %c127] : memref<4x512xf32, #tpu.memory_space<vmem>>, vector<4x256xf32>
    %cst_35 = arith.constant 0.000000e+00 : f32
    %69 = vector.shape_cast %32 : vector<1x256xi1> to vector<1x256xi1>
    %70 = vector.broadcast %69 : vector<1x256xi1> to vector<4x256xi1>
    %71 = vector.broadcast %cst_35 : f32 to vector<4x256xf32>
    %72 = arith.select %70, %68, %71 : vector<4x256xi1>, vector<4x256xf32>
    %c3 = arith.constant 3 : index
    %c0_36 = arith.constant 0 : index
    %c0_37 = arith.constant 0 : index
    %73 = vector.load %arg2[%c3, %c0_36, %c0_37] : memref<9x8x4xf32, #tpu.memory_space<vmem>>, vector<1x8x4xf32>
    %74 = vector.shape_cast %73 : vector<1x8x4xf32> to vector<8x4xf32>
    %cst_38 = arith.constant dense<0.000000e+00> : vector<8x256xf32>
    %75 = tpu.matmul %74, %72, %cst_38 {dimension_numbers = #tpu.dot_dimension_numbers<[1], [0], [0], [1], [0, 0, 1, 1], [], []>} : vector<8x4xf32>, vector<4x256xf32>, vector<8x256xf32> -> vector<8x256xf32>
    %76 = arith.addf %67, %75 : vector<8x256xf32>
    %c0_39 = arith.constant 0 : index
    %c128_40 = arith.constant 128 : index
    %77 = vector.load %arg5[%c0_39, %c128_40] : memref<4x512xf32, #tpu.memory_space<vmem>>, vector<4x256xf32>
    %c4 = arith.constant 4 : index
    %c0_41 = arith.constant 0 : index
    %c0_42 = arith.constant 0 : index
    %78 = vector.load %arg2[%c4, %c0_41, %c0_42] : memref<9x8x4xf32, #tpu.memory_space<vmem>>, vector<1x8x4xf32>
    %79 = vector.shape_cast %78 : vector<1x8x4xf32> to vector<8x4xf32>
    %cst_43 = arith.constant dense<0.000000e+00> : vector<8x256xf32>
    %80 = tpu.matmul %79, %77, %cst_43 {dimension_numbers = #tpu.dot_dimension_numbers<[1], [0], [0], [1], [0, 0, 1, 1], [], []>} : vector<8x4xf32>, vector<4x256xf32>, vector<8x256xf32> -> vector<8x256xf32>
    %81 = arith.addf %76, %80 : vector<8x256xf32>
    %c0_44 = arith.constant 0 : index
    %c129 = arith.constant 129 : index
    %82 = vector.load %arg5[%c0_44, %c129] : memref<4x512xf32, #tpu.memory_space<vmem>>, vector<4x256xf32>
    %cst_45 = arith.constant 0.000000e+00 : f32
    %83 = vector.shape_cast %41 : vector<1x256xi1> to vector<1x256xi1>
    %84 = vector.broadcast %83 : vector<1x256xi1> to vector<4x256xi1>
    %85 = vector.broadcast %cst_45 : f32 to vector<4x256xf32>
    %86 = arith.select %84, %82, %85 : vector<4x256xi1>, vector<4x256xf32>
    %c5 = arith.constant 5 : index
    %c0_46 = arith.constant 0 : index
    %c0_47 = arith.constant 0 : index
    %87 = vector.load %arg2[%c5, %c0_46, %c0_47] : memref<9x8x4xf32, #tpu.memory_space<vmem>>, vector<1x8x4xf32>
    %88 = vector.shape_cast %87 : vector<1x8x4xf32> to vector<8x4xf32>
    %cst_48 = arith.constant dense<0.000000e+00> : vector<8x256xf32>
    %89 = tpu.matmul %88, %86, %cst_48 {dimension_numbers = #tpu.dot_dimension_numbers<[1], [0], [0], [1], [0, 0, 1, 1], [], []>} : vector<8x4xf32>, vector<4x256xf32>, vector<8x256xf32> -> vector<8x256xf32>
    %90 = arith.addf %81, %89 : vector<8x256xf32>
    %c0_49 = arith.constant 0 : index
    %c143 = arith.constant 143 : index
    %91 = vector.load %arg5[%c0_49, %c143] : memref<4x512xf32, #tpu.memory_space<vmem>>, vector<4x256xf32>
    %cst_50 = arith.constant 0.000000e+00 : f32
    %92 = vector.shape_cast %32 : vector<1x256xi1> to vector<1x256xi1>
    %93 = vector.broadcast %92 : vector<1x256xi1> to vector<4x256xi1>
    %94 = vector.broadcast %cst_50 : f32 to vector<4x256xf32>
    %95 = arith.select %93, %91, %94 : vector<4x256xi1>, vector<4x256xf32>
    %c6 = arith.constant 6 : index
    %c0_51 = arith.constant 0 : index
    %c0_52 = arith.constant 0 : index
    %96 = vector.load %arg2[%c6, %c0_51, %c0_52] : memref<9x8x4xf32, #tpu.memory_space<vmem>>, vector<1x8x4xf32>
    %97 = vector.shape_cast %96 : vector<1x8x4xf32> to vector<8x4xf32>
    %cst_53 = arith.constant dense<0.000000e+00> : vector<8x256xf32>
    %98 = tpu.matmul %97, %95, %cst_53 {dimension_numbers = #tpu.dot_dimension_numbers<[1], [0], [0], [1], [0, 0, 1, 1], [], []>} : vector<8x4xf32>, vector<4x256xf32>, vector<8x256xf32> -> vector<8x256xf32>
    %99 = arith.addf %90, %98 : vector<8x256xf32>
    %c0_54 = arith.constant 0 : index
    %c144 = arith.constant 144 : index
    %100 = vector.load %arg5[%c0_54, %c144] : memref<4x512xf32, #tpu.memory_space<vmem>>, vector<4x256xf32>
    %c7 = arith.constant 7 : index
    %c0_55 = arith.constant 0 : index
    %c0_56 = arith.constant 0 : index
    %101 = vector.load %arg2[%c7, %c0_55, %c0_56] : memref<9x8x4xf32, #tpu.memory_space<vmem>>, vector<1x8x4xf32>
    %102 = vector.shape_cast %101 : vector<1x8x4xf32> to vector<8x4xf32>
    %cst_57 = arith.constant dense<0.000000e+00> : vector<8x256xf32>
    %103 = tpu.matmul %102, %100, %cst_57 {dimension_numbers = #tpu.dot_dimension_numbers<[1], [0], [0], [1], [0, 0, 1, 1], [], []>} : vector<8x4xf32>, vector<4x256xf32>, vector<8x256xf32> -> vector<8x256xf32>
    %104 = arith.addf %99, %103 : vector<8x256xf32>
    %c0_58 = arith.constant 0 : index
    %c145 = arith.constant 145 : index
    %105 = vector.load %arg5[%c0_58, %c145] : memref<4x512xf32, #tpu.memory_space<vmem>>, vector<4x256xf32>
    %cst_59 = arith.constant 0.000000e+00 : f32
    %106 = vector.shape_cast %41 : vector<1x256xi1> to vector<1x256xi1>
    %107 = vector.broadcast %106 : vector<1x256xi1> to vector<4x256xi1>
    %108 = vector.broadcast %cst_59 : f32 to vector<4x256xf32>
    %109 = arith.select %107, %105, %108 : vector<4x256xi1>, vector<4x256xf32>
    %c8 = arith.constant 8 : index
    %c0_60 = arith.constant 0 : index
    %c0_61 = arith.constant 0 : index
    %110 = vector.load %arg2[%c8, %c0_60, %c0_61] : memref<9x8x4xf32, #tpu.memory_space<vmem>>, vector<1x8x4xf32>
    %111 = vector.shape_cast %110 : vector<1x8x4xf32> to vector<8x4xf32>
    %cst_62 = arith.constant dense<0.000000e+00> : vector<8x256xf32>
    %112 = tpu.matmul %111, %109, %cst_62 {dimension_numbers = #tpu.dot_dimension_numbers<[1], [0], [0], [1], [0, 0, 1, 1], [], []>} : vector<8x4xf32>, vector<4x256xf32>, vector<8x256xf32> -> vector<8x256xf32>
    %113 = arith.addf %104, %112 : vector<8x256xf32>
    %cst_63 = arith.constant 0.000000e+00 : f32
    %114 = vector.broadcast %cst_63 : f32 to vector<8x256xf32>
    %115 = arith.maximumf %113, %114 : vector<8x256xf32>
    %c0_64 = arith.constant 0 : index
    %c0_65 = arith.constant 0 : index
    %c0_66 = arith.constant 0 : index
    %116 = vector.load %arg4[%c0_64, %c0_65, %c0_66] : memref<1x8x256xf32, #tpu.memory_space<vmem>>, vector<1x8x256xf32>
    %117 = vector.shape_cast %116 : vector<1x8x256xf32> to vector<8x256xf32>
    %118 = vector.shape_cast %115 : vector<8x256xf32> to vector<1x8x256xf32>
    tpu.vector_store %arg4[%c0_64, %c0_65, %c0_66], %118 {strides = array<i32>} : memref<1x8x256xf32, #tpu.memory_space<vmem>>, vector<1x8x256xf32>,
    return
  }
  func.func @transform_0(%arg0: i32) -> (i32, i32, i32) {
    %c0_i32 = arith.constant 0 : i32
    %c0_i32_0 = arith.constant 0 : i32
    %c0_i32_1 = arith.constant 0 : i32
    return %arg0, %c0_i32, %c0_i32_0 : i32, i32, i32
  }
  func.func @transform_1(%arg0: i32) -> (i32, i32, i32) {
    %c0_i32 = arith.constant 0 : i32
    %c0_i32_0 = arith.constant 0 : i32
    %c0_i32_1 = arith.constant 0 : i32
    %c0_i32_2 = arith.constant 0 : i32
    return %c0_i32, %c0_i32_0, %c0_i32_1 : i32, i32, i32
  }
  func.func @transform_2(%arg0: i32) -> (i32, i32) {
    %c0_i32 = arith.constant 0 : i32
    %c0_i32_0 = arith.constant 0 : i32
    %c0_i32_1 = arith.constant 0 : i32
    return %c0_i32, %c0_i32_0 : i32, i32
  }
  func.func @transform_3(%arg0: i32) -> (i32, i32, i32) {
    %c0_i32 = arith.constant 0 : i32
    %c0_i32_0 = arith.constant 0 : i32
    %c0_i32_1 = arith.constant 0 : i32
    return %arg0, %c0_i32, %c0_i32_0 : i32, i32, i32
  }
}

</mosaic_0001>

<bundles_post_ra>
// kernel: tpu_custom_call.1
= control target key start
LH: loop header
LB: loop body
LE: loop exit
PB: predicated region body
PF: predicated region fallthrough
CT: control target
= control target key end

     0   :  { %8 = vsyncpa [#allocation4], 0  ;;  %s1602_s0 = inlined_call_operand.vmem [shape: f32[2,4,256], index: 0, kind: input, shape index: {}]   ;;  %s1603_s1 = inlined_call_operand.vmem [shape: f32[9,8,4], index: 1, kind: input, shape index: {}]   ;;  %s1604_s2 = inlined_call_operand.vmem [shape: f32[8,1], index: 2, kind: input, shape index: {}]   ;;  %s1605_s3 = inlined_call_operand.hbm [shape: f32[2,8,256], index: 3, kind: output, shape index: {}]  }
   0x1   :  { %10 = vsyncpa [#allocation4 + $0x1], 0  ;;  %s1392_s12 = smov 0   ;;  %s1394_s13 = smov 0  }
   0x2   :  { %s1396_s14 = smov 0   ;;  %s1398_s15 = smov 0  }
   0x3 LB: > { %s1413_s16 = sadd.s32 4294967295, %s1359_s15   ;;  %s1198_s17 = sadd.s32 4294967294, %s1359_s15   ;;  %s1359_s15 = sphi %s1398_s15, %s1611_s15   ;;  %s1355_s14 = sphi %s1396_s14, %s1610_s14   ;;  %s1351_s13 = sphi %s1394_s13, %s1609_s13   ;;  %s1347_s12 = sphi %s1392_s12, %s1608_s12  }
   0x4   : > { %s1417_s18 = sadd.s32 1, %s1359_s15   ;;  %s91_s19 = sadd.s32 1, %s1355_s14 }
   0x5   : > { %s88_s20 = ssub.s32 %s1359_s15, %s1417_s18  ;;  %p101_p0 = scmp.ne.s32.totalorder %s1355_s14, %s1351_s13 }
   0x6   : > { %p89_p1 = scmp.eq.s32.totalorder %s88_s20, 0  ;;  %p102_p2 = scmp.eq.s32.totalorder %s1413_s16, 1 }
   0x7   : > { %p107_p3 = scmp.ne.s32.totalorder %s1351_s13, %s1347_s12  ;;  %p108_p4 = scmp.eq.s32.totalorder %s1198_s17, 1 }
   0x8   : > { %s1428_s21 = scalar_select %p89_p1, %s1355_s14, %s91_s19  }
   0x9   : > { %p1430_p5 = por %p102_p2, %p101_p0  ;;  %p1434_p6 = por %p108_p4, %p107_p3 }
   0xa   : > { %p1201_p7 = scmp.ge.s32.totalorder %s1359_s15, 1  ;;  %p140_p8 = scmp.lt.s32.totalorder %s1359_s15, 3 }
   0xc   : > { %p141_p9 = pnand %p1201_p7, %p140_p8 }
   0xd   : > { %p164_p10 = scmp.lt.s32.totalorder (!%p141_p9), %s1413_s16, 1  ;;  %s1362_s29 = smov (!%p141_p9), 17  }
   0xe   : > { %144 = sbr.rel (%p141_p9) target bundleno = 407 (0x197), region = 32  ;;  %s1363_s30 = smov (!%p141_p9), 16  }
   0xf   : > { %s1364_s4 = smov (!%p141_p9), 15   ;;  %s1365_s5 = smov (!%p141_p9), 1  }
  0x10   : > { %s1366_s6 = smov (!%p141_p9), 127   ;;  %s1367_s7 = smov (!%p141_p9), 113  }
  0x11   : > { %s1368_s8 = smov (!%p141_p9), 112   ;;  %s1370_s9 = smov (!%p141_p9), 111  }
  0x12   : > { %s161_s17 = sand.u32 (!%p141_p9), 1, %s1351_s13   ;;  %s1246_s20 = sshll.u32 (!%p141_p9), %s1413_s16, 8 }
  0x13   : > { %v1361_v0 = vmov 0.0   ;;  %s165_s24 = scalar_select %p164_p10, %s1413_s16, 1  ;;  %v1369_v12 = vmov 0   ;;  %v216_v14 = vld [vmem:[%s1604_s2] sm:$0xff]  ;;  %v173_v15 = vlaneseq  ;;  %vm237_vm0 = vcmask 138240   ;;  %v1208_v36 = vld [vmem:[%s1603_s1 + $0x8] sm:$0xff] }
  0x14   : > { %169 = vst [vmem:[#allocation2] sm:$0xf] %v1361_v0  ;;  %170 = vst [vmem:[#allocation2 + $0xc] sm:$0xf] %v1361_v0  ;;  %320 = vmatprep.mubr.f32.mxu0 %v1361_v0  ;;  %416 = vmatprep.mubr.f32.mxu1 %v1361_v0  ;;  %vm249_vm1 = vcmask 1043456   ;;  %vm342_vm2 = vcmask 130048  }
  0x15   : > { %s1245_s25 = sshll.u32 %s165_s24, 3  ;;  %1296 = vset.pattern.permute.xlu0 %v1369_v12  ;;  %v174_v16 = vand.u32 127, %v173_v15  ;;  %vm440_vm5 = vcmask 121856   ;;  %v244_v39 = vld [vmem:[%s1603_s1] sm:$0xff]  ;;  %vm245_vm6 = vcmask 31744   ;;  %vm542_vm9 = vcmask 7168  }
  0x16   : > { %s168_s28 = scalar_lea.vmem %s1602_s0, %s1245_s25  ;;  %v1212_v46 = vld [vmem:[%s1603_s1 + $0x10] sm:$0xff]  ;;  %vm729_vm10 = vcmask 1039360   ;;  %v1216_v53 = vld [vmem:[%s1603_s1 + $0x18] sm:$0xff]  ;;  %v1220_v54 = vld [vmem:[%s1603_s1 + $0x20] sm:$0xff]  ;;  %vm831_vm11 = vcmask 924672   ;;  %vm935_vm12 = vcmask 916480  }
  0x17   : > { %v1449_v1 = vld [vmem:[%s168_s28] sm:$0xff]  ;;  %v175_v17 = vadd.s32 128, %v174_v16  ;;  %v180_v21 = vand.u32 15, %v174_v16  ;;  %v1224_v62 = vld [vmem:[%s1603_s1 + $0x28] sm:$0xff]  ;;  %vm1029_vm13 = vcmask 908288   ;;  %s1202_s19 = sshll.u32 %s161_s17, 4  ;;  %s1137_s28 = scalar_lea.hbm %s1605_s3, %s1246_s20 }
  0x18   : > { %172 = vst [vmem:[#allocation2 + $0x4] sm:$0xff] %v1449_v1  ;;  %v1454_v8 = vcombine.high %v1449_v1, %v1449_v1  ;;  %s163_s24 = scalar_lea.vmem [#allocation3], %s1202_s19 }
  0x19   : > { %v187_v20 = vand.u32 15, %v175_v17  ;;  %v1469_v25 = vadd.s32 4294967295, %v180_v21  ;;  %v1473_v28 = vadd.s32 1, %v180_v21  ;;  %s1139_s25 = sshll.u32 %s163_s24, 4  ;;  %s1140_s25 = int_to_ptr.vmem [resolvable:$true] %s1139_s25 }
  0x1b   : > { %v719_v9 = vld [vmem:[#allocation2 + $0xc] sm:$0xf]  ;;  %v1467_v24 = vadd.s32 4294967295, %v187_v20  ;;  %vm202_vm4 = vcmp.ge.s32.totalorder %v1469_v25, 0  ;;  %v1475_v29 = vadd.s32 1, %v187_v20  ;;  %vm212_vm7 = vcmp.lt.s32.totalorder %v1473_v28, 16 }
  0x1c   : > { %v821_v10 = vld [vmem:[#allocation2 + $0xc] sm:$0xf]  ;;  %v1236_v20 = vld [vmem:[%s1603_s1 + $0x40] sm:$0xff] }
  0x1d   : > { %v923_v11 = vld [vmem:[#allocation2 + $0xc] sm:$0xf]  ;;  %vm203_vm3 = vcmp.ge.s32.totalorder %v1467_v24, 0  ;;  %vm213_vm8 = vcmp.lt.s32.totalorder %v1475_v29, 16 }
  0x1e   : > { %v1019_v13 = vld [vmem:[#allocation2 + $0xc] sm:$0xf] }
  0x1f   : > { %v223_v2 = vld [vmem:[#allocation2 + $0x8] sm:$0xf]  ;;  %v222_v3 = vld [vmem:[#allocation2] sm:$0xff] }
  0x20   : > { %235 = vrot.lane.b32.xlu0 %v223_v2, %s1362_s29  ;;  %231 = vrot.lane.b32.xlu1 %v222_v3, %s1362_s29  ;;  %v330_v4 = vld [vmem:[#allocation2 + $0x8] sm:$0xf]  ;;  %v230_v6 = vcombine.high %v222_v3, %v222_v3 }
  0x21   : > { %v426_v5 = vld [vmem:[#allocation2 + $0x8] sm:$0xf] }
  0x22   : > { %v532_v7 = vld [vmem:[#allocation2 + $0x8] sm:$0xf] }
  0x24   : > { %340 = vrot.lane.b32.xlu0 %v330_v4, %s1363_s30  ;;  %336 = vrot.lane.b32.xlu1 %v222_v3, %s1363_s30 }
  0x28   : > { %434 = vrot.lane.b32.xlu0 %v222_v3, %s1364_s4  ;;  %438 = vrot.lane.b32.xlu1 %v426_v5, %s1364_s4 }
  0x2c   : > { %338 = vrot.lane.b32.xlu1 %v230_v6, %s1363_s30  ;;  %233 = vrot.lane.b32.xlu0 %v230_v6, %s1362_s29  ;;  %s1125_s29 = scalar_lea.sflag [#allocation4], %s161_s17  ;;  %s1299_s30 = scalar_lea.vmem %s1140_s25, 256 }
  0x2d   : > { %p1300_p11 = scmp.ne.s32.totalorder %s1140_s25, %s1299_s30 }
  0x2f   : > { %p1301_p12 = pnand %p1300_p11, %p1430_p5 }
  0x30   : > { %538 = vrot.lane.b32.xlu1 %v230_v6, %s1365_s5  ;;  %436 = vrot.lane.b32.xlu0 %v230_v6, %s1364_s4  ;;  %s1371_s4 = smov [#allocation3]  }
  0x31   : > { %p1302_p13 = pneg %p1301_p12  ;;  %s1303_s16 = sshll.u32 %s1371_s4, 4  ;;  %s1304_s16 = int_to_ptr.vmem [resolvable:$false] %s1303_s16 }
  0x32   : > { %p1306_p0 = scmp.lt.s32.totalorder %s1140_s25, %s1304_s16 }
  0x34   : > { %536 = vrot.lane.b32.xlu1 %v222_v3, %s1365_s5  ;;  %540 = vrot.lane.b32.xlu0 %v532_v7, %s1365_s5  ;;  %v1228_v7 = vld [vmem:[%s1603_s1 + $0x30] sm:$0xff]  ;;  %s1305_s5 = scalar_lea.vmem %s1304_s16, 512 }
  0x35   : > { %p1307_p1 = scmp.lt.s32.totalorder %s1305_s5, %s1299_s30 }
  0x37   : > { %p1308_p2 = por %p1307_p1, %p1306_p0 }
  0x38   : > { %727 = vrot.lane.b32.xlu1 %v719_v9, %s1366_s6  ;;  %725 = vrot.lane.b32.xlu0 %v1454_v8, %s1366_s6 }
  0x39   : > { %p1309_p3 = pnand %p1308_p2, %p1302_p13 }
  0x3c   : > { %827 = vrot.lane.b32.xlu1 %v1454_v8, %s1367_s7  ;;  %723 = vrot.lane.b32.xlu0 %v1449_v1, %s1366_s6 }
  0x40   : > { %825 = vrot.lane.b32.xlu1 %v1449_v1, %s1367_s7  ;;  %829 = vrot.lane.b32.xlu0 %v821_v10, %s1367_s7 }
  0x44   : > { %933 = vrot.lane.b32.xlu1 %v923_v11, %s1368_s8  ;;  %931 = vrot.lane.b32.xlu0 %v1454_v8, %s1368_s8 }
  0x48   : > { %1025 = vrot.lane.b32.xlu1 %v1454_v8, %s1370_s9  ;;  %929 = vrot.lane.b32.xlu0 %v1449_v1, %s1368_s8 }
  0x4c   : > { %1023 = vrot.lane.b32.xlu1 %v1449_v1, %s1370_s9  ;;  %1027 = vrot.lane.b32.xlu0 %v1019_v13, %s1370_s9  ;;  %v1232_v13 = vld [vmem:[%s1603_s1 + $0x38] sm:$0xff] }
  0x50   : > { %219 = vperm.xlu0 %1296, %v216_v14  }
  0x92   : > { %v236_v18 = vpop.permute.xlu0 %235  ;;  %v232_v19 = vpop.permute.xlu1 %231 }
  0x96   : > { %v341_v22 = vpop.permute.xlu0 %340  ;;  %v337_v23 = vpop.permute.xlu1 %336 }
  0x9a   : > { %v435_v26 = vpop.permute.xlu0 %434  ;;  %v439_v27 = vpop.permute.xlu1 %438 }
  0x9e   : > { %v339_v30 = vpop.permute.xlu1 %338  ;;  %v234_v31 = vpop.permute.xlu0 %233 }
  0x9f   : > { %v238_v32 = vsel %vm237_vm0, %v232_v19, %v234_v31  ;;  %v344_v33 = vsel %vm342_vm2, %v339_v30, %v341_v22  ;;  %v239_v34 = vsel %vm237_vm0, %v234_v31, %v236_v18  ;;  %v343_v35 = vsel %vm342_vm2, %v337_v23, %v339_v30 }
  0xa0   : > { %1209 = vmatprep.subr.msk.mxu1 %vm249_vm1, %v344_v33  ;;  %v243_v37 = vsel %vm203_vm3, %v239_v34, 0.0  ;;  %v242_v38 = vsel %vm202_vm4, %v238_v32, 0.0 }
  0xa1   : > { %1205 = vmatprep.subr.msk.mxu0 %vm249_vm1, %v243_v37  ;;  %1210 = vmatpush1.msk.msra.mxu1 %vm249_vm1, %v343_v35 }
  0xa2   : > { %v539_v40 = vpop.permute.xlu1 %538  ;;  %1206 = vmatpush1.msk.msra.mxu0 %vm249_vm1, %v242_v38  ;;  %v437_v41 = vpop.permute.xlu0 %436  ;;  %1211 = vmatmul.mubr.msk.f32.vlgmr.msra.gmra.mxu1 %vm245_vm6, %v1208_v36 }
  0xa3   : > { %v441_v42 = vsel %vm440_vm5, %v435_v26, %v437_v41  ;;  %v442_v43 = vsel %vm440_vm5, %v437_v41, %v439_v27  ;;  %1207 = vmatmul.mubr.msk.f32.vlgmr.msra.gmra.mxu0 %vm245_vm6, %v244_v39  ;;  %624 = vmatprep.mubr.f32.mxu1 %v1361_v0 }
  0xa4   : > { %v445_v44 = vsel %vm212_vm7, %v441_v42, 0.0  ;;  %v446_v45 = vsel %vm213_vm8, %v442_v43, 0.0  ;;  %522 = vmatprep.mubr.f32.mxu0 %v1361_v0 }
  0xa5   : > { %1213 = vmatprep.subr.msk.mxu0 %vm249_vm1, %v446_v45 }
  0xa6   : > { %v537_v47 = vpop.permute.xlu1 %536  ;;  %1214 = vmatpush1.msk.msra.mxu0 %vm249_vm1, %v445_v44  ;;  %v541_v48 = vpop.permute.xlu0 %540 }
  0xa7   : > { %v543_v49 = vsel %vm542_vm9, %v537_v47, %v539_v40  ;;  %v544_v50 = vsel %vm542_vm9, %v539_v40, %v541_v48  ;;  %1215 = vmatmul.mubr.msk.f32.vlgmr.msra.gmra.mxu0 %vm245_vm6, %v1212_v46  ;;  %1221 = vmatprep.subr.msk.mxu0 %vm249_vm1, %v1454_v8 }
  0xa8   : > { %v547_v51 = vsel %vm202_vm4, %v543_v49, 0.0  ;;  %v548_v52 = vsel %vm203_vm3, %v544_v50, 0.0  ;;  %1222 = vmatpush1.msk.msra.mxu0 %vm249_vm1, %v1449_v1  ;;  %709 = vmatprep.mubr.f32.mxu0 %v1361_v0 }
  0xa9   : > { %1217 = vmatprep.subr.msk.mxu1 %vm249_vm1, %v548_v52 }
  0xaa   : > { %v728_v55 = vpop.permute.xlu1 %727  ;;  %1218 = vmatpush1.msk.msra.mxu1 %vm249_vm1, %v547_v51  ;;  %v726_v56 = vpop.permute.xlu0 %725 }
  0xab   : > { %v731_v57 = vsel %vm729_vm10, %v726_v56, %v728_v55  ;;  %1219 = vmatmul.mubr.msk.f32.vlgmr.msra.gmra.mxu1 %vm245_vm6, %v1216_v53  ;;  %1223 = vmatmul.mubr.msk.f32.vlgmr.msra.gmra.mxu0 %vm245_vm6, %v1220_v54 }
  0xac   : > { %v735_v58 = vsel %vm213_vm8, %v731_v57, 0.0  ;;  %811 = vmatprep.mubr.f32.mxu1 %v1361_v0  ;;  %913 = vmatprep.mubr.f32.mxu0 %v1361_v0 }
  0xad   : > { %1225 = vmatprep.subr.msk.mxu1 %vm249_vm1, %v735_v58 }
  0xae   : > { %v828_v59 = vpop.permute.xlu1 %827  ;;  %v724_v60 = vpop.permute.xlu0 %723 }
  0xaf   : > { %v730_v61 = vsel %vm729_vm10, %v724_v60, %v726_v56 }
  0xb0   : > { %v734_v63 = vsel %vm212_vm7, %v730_v61, 0.0 }
  0xb1   : > { %1226 = vmatpush1.msk.msra.mxu1 %vm249_vm1, %v734_v63 }
  0xb2   : > { %v826_v1 = vpop.permute.xlu1 %825  ;;  %v830_v2 = vpop.permute.xlu0 %829  ;;  %1227 = vmatmul.mubr.msk.f32.vlgmr.msra.gmra.mxu1 %vm245_vm6, %v1224_v62 }
  0xb3   : > { %v832_v3 = vsel %vm831_vm11, %v826_v1, %v828_v59  ;;  %v833_v4 = vsel %vm831_vm11, %v828_v59, %v830_v2  ;;  %1009 = vmatprep.mubr.f32.mxu1 %v1361_v0 }
  0xb4   : > { %v836_v5 = vsel %vm202_vm4, %v832_v3, 0.0  ;;  %v837_v6 = vsel %vm203_vm3, %v833_v4, 0.0 }
  0xb5   : > { %1229 = vmatprep.subr.msk.mxu0 %vm249_vm1, %v837_v6 }
  0xb6   : > { %v934_v8 = vpop.permute.xlu1 %933  ;;  %1230 = vmatpush1.msk.msra.mxu0 %vm249_vm1, %v836_v5  ;;  %v932_v9 = vpop.permute.xlu0 %931 }
  0xb7   : > { %v937_v10 = vsel %vm935_vm12, %v932_v9, %v934_v8  ;;  %1231 = vmatmul.mubr.msk.f32.vlgmr.msra.gmra.mxu0 %vm245_vm6, %v1228_v7 }
  0xb8   : > { %1233 = vmatprep.subr.msk.mxu1 %vm249_vm1, %v937_v10  ;;  %1111 = vmatprep.mubr.f32.mxu0 %v1361_v0 }
  0xba   : > { %v1026_v11 = vpop.permute.xlu1 %1025  ;;  %v930_v12 = vpop.permute.xlu0 %929 }
  0xbb   : > { %v936_v14 = vsel %vm935_vm12, %v930_v12, %v932_v9 }
  0xbc   : > { %1234 = vmatpush1.msk.msra.mxu1 %vm249_vm1, %v936_v14 }
  0xbd   : > { %1235 = vmatmul.mubr.msk.f32.vlgmr.msra.gmra.mxu1 %vm245_vm6, %v1232_v13 }
  0xbe   : > { %v1024_v15 = vpop.permute.xlu1 %1023  ;;  %v1028_v16 = vpop.permute.xlu0 %1027 }
  0xbf   : > { %v1030_v17 = vsel %vm1029_vm13, %v1024_v15, %v1026_v11  ;;  %v1031_v18 = vsel %vm1029_vm13, %v1026_v11, %v1028_v16 }
  0xc0   : > { %v1034_v19 = vsel %vm212_vm7, %v1030_v17, 0.0  ;;  %v1035_v0 = vsel %vm213_vm8, %v1031_v18, 0.0 }
  0xc1   : > { %1237 = vmatprep.subr.msk.mxu0 %vm249_vm1, %v1035_v0 }
  0xc2   : > { %1238 = vmatpush1.msk.msra.mxu0 %vm249_vm1, %v1034_v19 }
  0xc3   : > { %1239 = vmatmul.mubr.msk.f32.vlgmr.msra.gmra.mxu0 %vm245_vm6, %v1236_v20 }
  0xcb   : > { %v220_v21 = vpop.permute.xlu0 %219 }
 0x162   : > { %v418_v25 = vpop.f32.mrf.mxu1 }
 0x163   : > { %v322_v22 = vpop.f32.mrf.mxu0 }
 0x164   : > { %v327_v23 = vadd.f32 %v322_v22, %v220_v21  ;;  %v420_v28 = vpop.f32.mrf.mxu1 }
 0x165   : > { %v324_v24 = vpop.f32.mrf.mxu0 }
 0x166   : > { %v328_v26 = vadd.f32 %v324_v24, %v220_v21  ;;  %v423_v27 = vadd.f32 %v418_v25, %v327_v23 }
 0x167   : > { %v524_v29 = vpop.f32.mrf.mxu0 }
 0x168   : > { %v424_v30 = vadd.f32 %v420_v28, %v328_v26  ;;  %v529_v31 = vadd.f32 %v524_v29, %v423_v27 }
 0x169   : > { %v526_v32 = vpop.f32.mrf.mxu0 }
 0x16a   : > { %v530_v34 = vadd.f32 %v526_v32, %v424_v30 }
 0x16b   : > { %v626_v33 = vpop.f32.mrf.mxu1  ;;  %v711_v37 = vpop.f32.mrf.mxu0 }
 0x16c   : > { %v631_v35 = vadd.f32 %v626_v33, %v529_v31 }
 0x16d   : > { %v628_v36 = vpop.f32.mrf.mxu1  ;;  %v713_v40 = vpop.f32.mrf.mxu0 }
 0x16e   : > { %v632_v38 = vadd.f32 %v628_v36, %v530_v34  ;;  %v716_v39 = vadd.f32 %v711_v37, %v631_v35 }
 0x170   : > { %v717_v42 = vadd.f32 %v713_v40, %v632_v38 }
 0x172   : > { %v813_v41 = vpop.f32.mrf.mxu1 }
 0x173   : > { %v818_v43 = vadd.f32 %v813_v41, %v716_v39 }
 0x174   : > { %v815_v44 = vpop.f32.mrf.mxu1 }
 0x175   : > { %v819_v46 = vadd.f32 %v815_v44, %v717_v42 }
 0x177   : > { %v915_v45 = vpop.f32.mrf.mxu0 }
 0x178   : > { %v920_v47 = vadd.f32 %v915_v45, %v818_v43 }
 0x179   : > { %v917_v48 = vpop.f32.mrf.mxu0 }
 0x17a   : > { %v921_v50 = vadd.f32 %v917_v48, %v819_v46 }
 0x17d   : > { %v1011_v49 = vpop.f32.mrf.mxu1 }
 0x17e   : > { %v1016_v51 = vadd.f32 %v1011_v49, %v920_v47 }
 0x17f   : > { %v1013_v52 = vpop.f32.mrf.mxu1 }
 0x180   : > { %v1017_v54 = vadd.f32 %v1013_v52, %v921_v50 }
 0x183   : > { %v1113_v53 = vpop.f32.mrf.mxu0 }
 0x184   : > { %v1118_v55 = vadd.f32 %v1113_v53, %v1016_v51 }
 0x185   : > { %v1115_v56 = vpop.f32.mrf.mxu0 }
 0x186   : > { %v1120_v57 = vmax.f32 %v1118_v55, 0.0  ;;  %v1119_v58 = vadd.f32 %v1115_v56, %v1017_v54 }
 0x188   : > { %1122 = vst [vmem:[%s163_s24] sm:$0xff] %v1120_v57  ;;  %v1121_v59 = vmax.f32 %v1119_v58, 0.0 }
 0x18a   : > { %1123 = vst [vmem:[%s163_s24 + $0x8] sm:$0xff] %v1121_v59 }
 0x18b   : > { %1312 = shalt.err (!%p1309_p3)
}
 0x18c   : > { %s1313_s6 = scalar_lea.hbm %s1137_s28, 256  ;;  %s1317_s9 = scalar_lea.hbm %s1605_s3, 512 }
 0x18d   : > { %p1314_p4 = scmp.ne.s32.totalorder %s1137_s28, %s1313_s6  ;;  %p1318_p9 = scmp.lt.s32.totalorder %s1137_s28, %s1605_s3 }
 0x18e   : > { %p1319_p10 = scmp.lt.s32.totalorder %s1317_s9, %s1313_s6 }
 0x18f   : > { %p1315_p7 = pnand %p1314_p4, %p1430_p5 }
 0x190   : > { %p1320_p11 = por %p1319_p10, %p1318_p9 }
 0x191   : > { %p1316_p8 = pneg %p1315_p7 }
 0x193   : > { %p1321_p12 = pnand %p1320_p11, %p1316_p8 }
 0x195   : > { %1324 = shalt.err (!%p1321_p12)
}
 0x196   : > { %1247 = dma.vmem_to_hbm [thread:$0]  (%p1430_p5), %s1140_s25, 256, %s1137_s28, %s1125_s29  }
 0x197 PF: > { %p1253_p13 = scmp.ge.s32.totalorder %s1359_s15, 2  ;;  %s1151_s17 = sand.u32 1, %s1347_s12  }
 0x198   : > { %s1152_s19 = scalar_lea.sflag [#allocation4], %s1151_s17 }
 0x199   : > { %p1250_p0 = pnand %p1253_p13, %p1434_p6 }
 0x19b   : > { %p1251_p1 = pneg %p1250_p0 }
 0x19d   : > { %1342 = dma.done.wait (%p1251_p1), %s1152_s19, 256  }
 0x19e   : > { %1344 = vsyncadd (%p1251_p1), %s1152_s19, 4294967040  ;;  %p13_p2 = scmp.ge.s32.totalorder %s1417_s18, 4   ;;  %s1608_s12 = smov %s1351_s13 }
 0x19f   : > { %s1609_s13 = smov %s1355_s14  ;;  %s1610_s14 = smov %s1428_s21 }
 0x1a0   : > { %s1611_s15 = smov %s1417_s18  ;;  %15 = sbr.rel (!%p13_p2) target bundleno = 3 (0x3), region = 75 }
 0x1a5   :  { %1157 = vsyncpa [#allocation4], 1 }
 0x1a6   :  { %1159 = vsyncpa [#allocation4 + $0x1], 1 }

</bundles_post_ra>
